<compile_context>
chip_gen: v6e
topology: v6e:2x2x1
jax: 0.10.0
libtpu: 0.0.40
codegen_flags: <defaults>
</compile_context>

<pallas_src>
import functools

import jax
import jax.numpy as jnp
import numpy as np
from jax.experimental import pallas as pl
from jax.experimental.pallas import tpu as pltpu

_EPS = 1e-5


# ------------------------------- helpers ------------------------------------ #

def _vmem_spec():
    return pl.BlockSpec(memory_space=pltpu.MemorySpace.VMEM)


def _round_up(v, m):
    return ((v + m - 1) // m) * m


def _col_masks(H, W, k):
    """(k, H*W) f32 table: mask[dw, lane] = 1 iff column (lane % W) + (dw - k//2)
    stays inside the image.  Row validity needs no mask: the scratch halo holds
    the stencil's neutral element (0 for conv/avg, -inf for max)."""
    p = k // 2
    col = jnp.arange(H * W, dtype=jnp.int32) % W
    return jnp.stack(
        [((col + dc >= 0) & (col + dc < W)).astype(jnp.float32)
         for dc in range(-p, p + 1)],
        axis=0)


# ------------------------------- kernels ------------------------------------ #

def _make_conv_kernel(N, C, H, W, k, OFF, PADW):
    """ReLU->BN->sepconv(k)->ReLU->BN->sepconv(k), shared sep-conv weights.

    Layout: activations (NC, HW) with NC = N*C on sublanes, HW on lanes.
    The depthwise conv reads statically lane-shifted windows of a zero-halo
    scratch; out-of-row taps read zeros (== PyTorch zero padding) and column
    wrap-around is cancelled by one mask multiply per column-offset group.
    """
    NC, HW, p = N * C, H * W, k // 2
    inv_count = 1.0 / float(N * H * W)
    TAIL = PADW - OFF - HW

    def relu_bn(x, m_chan, gamma, beta):
        # Fused ReLU -> BatchNorm (training batch stats) as one scale + bias.
        r = jnp.maximum(x, 0.0)
        # Cross-batch per-channel sums via the channel-replication matrix: keeps
        # everything at the native (NC, HW) shape (no sub-8-sublane reshapes).
        s1 = jnp.dot(m_chan, r, preferred_element_type=jnp.float32)
        s2 = jnp.dot(m_chan, r * r, preferred_element_type=jnp.float32)
        mean = jnp.sum(s1, axis=1, keepdims=True) * inv_count          # (NC, 1)
        ex2 = jnp.sum(s2, axis=1, keepdims=True) * inv_count           # (NC, 1)
        var = jnp.maximum(ex2 - mean * mean, 0.0)                      # clamp
        scale = gamma * jax.lax.rsqrt(var + _EPS)
        bias = beta - mean * scale
        return r * scale + bias

    def depthwise(pad_ref, h, dwv, cm):
        # 128-aligned unmasked interior store; halo already zero.
        pad_ref[:, pl.ds(OFF, HW)] = h
        acc = None
        for dw in range(k):                    # group taps by column offset
            dc = dw - p
            inner = None
            for dh in range(k):
                shift = (dh - p) * W + dc
                term = pad_ref[:, pl.ds(OFF + shift, HW)] * dwv[dh, dw]
                inner = term if inner is None else inner + term
            if dc != 0:                        # one mask multiply per group
                inner = inner * cm[dw:dw + 1, :]
            acc = inner if acc is None else acc + inner
        return acc

    def kernel(x_ref, cm_ref, dw_ref, pw_ref, mc_ref,
               g1_ref, b1_ref, g2_ref, b2_ref, o_ref, pad_ref):
        # Fill the halo once; every depthwise pass fully rewrites the interior.
        pad_ref[:, pl.ds(0, OFF)] = jnp.zeros((NC, OFF), jnp.float32)
        pad_ref[:, pl.ds(OFF + HW, TAIL)] = jnp.zeros((NC, TAIL), jnp.float32)

        cm = cm_ref[...]                       # (k, HW)
        dwv = dw_ref[...]                      # (k, k, NC, 1)
        pw = pw_ref[...]                       # (NC, NC) block-diag 1x1 conv
        mc = mc_ref[...]                       # (NC, NC) channel replication

        h = relu_bn(x_ref[...], mc, g1_ref[...], b1_ref[...])
        h = jnp.dot(pw, depthwise(pad_ref, h, dwv, cm),
                    preferred_element_type=jnp.float32)
        h = relu_bn(h, mc, g2_ref[...], b2_ref[...])
        h = jnp.dot(pw, depthwise(pad_ref, h, dwv, cm),
                    preferred_element_type=jnp.float32)
        o_ref[...] = h                         # lane-dense (8, 256) store

    return kernel


def _make_pool_kernel(N, C, H, W, mode, OFF, PADW):
    """3x3 stride-1 pooling: 'avg' (count_include_pad=True) or 'max' (-inf pad)."""
    NC, HW = N * C, H * W
    TAIL = PADW - OFF - HW
    fill = -jnp.inf if mode == "max" else 0.0

    def kernel(x_ref, cm_ref, o_ref, pad_ref):
        pad_ref[:, pl.ds(0, OFF)] = jnp.full((NC, OFF), fill, jnp.float32)
        pad_ref[:, pl.ds(OFF + HW, TAIL)] = jnp.full((NC, TAIL), fill, jnp.float32)
        pad_ref[:, pl.ds(OFF, HW)] = x_ref[...]
        cm = cm_ref[...]
        acc = None
        for dw in range(3):
            dc = dw - 1
            inner = None
            for dh in range(3):
                win = pad_ref[:, pl.ds(OFF + (dh - 1) * W + dc, HW)]
                if inner is None:
                    inner = win
                elif mode == "max":
                    inner = jnp.maximum(inner, win)
                else:
                    inner = inner + win
            if dc != 0:
                if mode == "max":
                    inner = jnp.where(cm[dw:dw + 1, :] > 0.5, inner, -jnp.inf)
                else:
                    inner = inner * cm[dw:dw + 1, :]
            if acc is None:
                acc = inner
            elif mode == "max":
                acc = jnp.maximum(acc, inner)
            else:
                acc = acc + inner
        if mode == "avg":
            acc = acc * (1.0 / 9.0)            # count_include_pad=True -> /9
        o_ref[...] = acc

    return kernel


# ------------------------------- wrapper ------------------------------------ #

@functools.partial(jax.jit, static_argnums=(2,))
def node_forward(params, x_nchw, op_id):
    """Forward of Node(planes, stride=1).  x_nchw: (N, C, H, W) float32."""
    if op_id == 4:                             # identity
        return x_nchw
    if op_id not in (0, 1, 2, 3):
        raise ValueError(f"invalid op_id {op_id}")

    N, C, H, W = x_nchw.shape
    NC, HW = N * C, H * W
    x2 = x_nchw.reshape(NC, HW).astype(jnp.float32)   # free reshape, no transpose
    out_sds = jax.ShapeDtypeStruct((NC, HW), jnp.float32)

    if op_id in (0, 1):
        k = 3 if op_id == 0 else 5
        tag = str(k)
        p = k // 2
        S = p * W + p                                  # halo (lanes) per side
        OFF = _round_up(S, 128)                        # 128-aligned interior start
        PADW = OFF + _round_up(HW + S, 128)

        # Depthwise (C,1,k,k) torch weight -> (k,k,NC,1) tiled over batch rows.
        dw_t = jnp.tile(jnp.transpose(params["dw" + tag][:, 0], (1, 2, 0)),
                        (1, 1, N))[..., None].astype(jnp.float32)
        # Pointwise (Cout,Cin) torch weight -> block-diagonal (NC,NC).
        w_blk = jnp.kron(jnp.eye(N, dtype=jnp.float32),
                         params["pw" + tag].astype(jnp.float32))
        # Channel-replication matrix for cross-batch BN sums.
        m_chan = jnp.kron(jnp.ones((N, N), jnp.float32),
                          jnp.eye(C, dtype=jnp.float32))
        g1t, b1t, g2t, b2t = [jnp.tile(v.astype(jnp.float32), (N,))[:, None]
                              for v in params["bn" + tag]]
        cmask = _col_masks(H, W, k)

        out = pl.pallas_call(
            _make_conv_kernel(N, C, H, W, k, OFF, PADW),
            out_shape=out_sds,
            in_specs=[_vmem_spec() for _ in range(9)],
            out_specs=_vmem_spec(),
            scratch_shapes=[pltpu.VMEM((NC, PADW), jnp.float32)],
        )(x2, cmask, dw_t, w_blk, m_chan, g1t, b1t, g2t, b2t)
    else:
        mode = "avg" if op_id == 2 else "max"
        S = W + 1
        OFF = _round_up(S, 128)
        PADW = OFF + _round_up(HW + S, 128)
        cmask = _col_masks(H, W, 3)

        out = pl.pallas_call(
            _make_pool_kernel(N, C, H, W, mode, OFF, PADW),
            out_shape=out_sds,
            in_specs=[_vmem_spec() for _ in range(2)],
            out_specs=_vmem_spec(),
            scratch_shapes=[pltpu.VMEM((NC, PADW), jnp.float32)],
        )(x2, cmask)

    return out.reshape(N, C, H, W)


# -------------------------------- params ------------------------------------ #

def init_node_params(planes, key):
    """Deterministic synthetic weights stored in PyTorch layouts:
       dwK: (C,1,k,k) depthwise Conv2d weight, pwK: (Cout,Cin) pointwise weight,
       bnK: (gamma1, beta1, gamma2, beta2) each (C,) with default BN init."""
    k1, k2, k3, k4 = jax.random.split(key, 4)

    def dw_init(k_rng, ksz):
        return jax.random.normal(k_rng, (planes, 1, ksz, ksz), jnp.float32) / ksz

    def pw_init(k_rng):
        return (jax.random.normal(k_rng, (planes, planes), jnp.float32)
                / jnp.sqrt(float(planes)))

    gamma = jnp.ones((planes,), jnp.float32)
    beta = jnp.zeros((planes,), jnp.float32)
    return {
        "dw3": dw_init(k1, 3), "pw3": pw_init(k2),
        "dw5": dw_init(k3, 5), "pw5": pw_init(k4),
        "bn3": (gamma, beta, gamma, beta),
        "bn5": (gamma, beta, gamma, beta),
    }


# ------------------------- pure-JAX reference check -------------------------- #

def _reference_forward(params, x, op_id):
    if op_id == 4:
        return x
    N, C, H, W = x.shape
    if op_id in (0, 1):
        k = 3 if op_id == 0 else 5
        tag = str(k)
        p = k // 2
        dw = params["dw" + tag]
        pw = params["pw" + tag].reshape(C, C, 1, 1)
        g1, b1, g2, b2 = params["bn" + tag]

        def bn(h, g, b):
            mean = jnp.mean(h, axis=(0, 2, 3), keepdims=True)
            var = jnp.var(h, axis=(0, 2, 3), keepdims=True)
            return ((h - mean) * jax.lax.rsqrt(var + _EPS) * g.reshape(1, C, 1, 1)
                    + b.reshape(1, C, 1, 1))

        def sepconv(h):
            h = jax.lax.conv_general_dilated(
                h, dw, (1, 1), ((p, p), (p, p)),
                dimension_numbers=("NCHW", "OIHW", "NCHW"),
                feature_group_count=C, precision=jax.lax.Precision.HIGHEST)
            h = jax.lax.conv_general_dilated(
                h, pw, (1, 1), ((0, 0), (0, 0)),
                dimension_numbers=("NCHW", "OIHW", "NCHW"),
                precision=jax.lax.Precision.HIGHEST)
            return h

        h = bn(jax.nn.relu(x), g1, b1)
        h = sepconv(h)
        h = bn(jax.nn.relu(h), g2, b2)
        h = sepconv(h)
        return h
    if op_id == 2:
        s = jax.lax.reduce_window(x, 0.0, jax.lax.add, (1, 1, 3, 3), (1, 1, 1, 1),
                                  ((0, 0), (0, 0), (1, 1), (1, 1)))
        return s / 9.0
    return jax.lax.reduce_window(x, -jnp.inf, jax.lax.max, (1, 1, 3, 3),
                                 (1, 1, 1, 1), ((0, 0), (0, 0), (1, 1), (1, 1)))


# --------------------------------- main -------------------------------------- #

if __name__ == "__main__":
    key = jax.random.PRNGKey(0)
    kx, kp = jax.random.split(key)

    N, C, H, W = 2, 4, 16, 16
    x = jax.random.normal(kx, (N, C, H, W), jnp.float32)
    params = init_node_params(C, kp)

    for op_id in range(5):
        out = jax.block_until_ready(node_forward(params, x, op_id))
        assert out.shape == (N, C, H, W), (op_id, out.shape)
        ref = jax.block_until_ready(_reference_forward(params, x, op_id))
        # conv ops use the MXU at default precision -> modest tolerance;
        # pool / identity are exact.
        tol = 5e-2 if op_id in (0, 1) else 1e-5
        np.testing.assert_allclose(np.asarray(out), np.asarray(ref),
                                   rtol=tol, atol=tol, err_msg=f"op_id={op_id}")

    print("KERNEL_OK")
</pallas_src>

<mosaic_0001>
module attributes {stable_mosaic.version = 11 : i64} {
  func.func @kernel(%arg0: memref<8x256xf32, #tpu.memory_space<vmem>>, %arg1: memref<3x256xf32, #tpu.memory_space<vmem>>, %arg2: memref<3x3x8x1xf32, #tpu.memory_space<vmem>>, %arg3: memref<8x8xf32, #tpu.memory_space<vmem>>, %arg4: memref<8x8xf32, #tpu.memory_space<vmem>>, %arg5: memref<8x1xf32, #tpu.memory_space<vmem>>, %arg6: memref<8x1xf32, #tpu.memory_space<vmem>>, %arg7: memref<8x1xf32, #tpu.memory_space<vmem>>, %arg8: memref<8x1xf32, #tpu.memory_space<vmem>>, %arg9: memref<8x256xf32, #tpu.memory_space<vmem>>, %arg10: memref<8x512xf32, #tpu.memory_space<vmem>>) attributes {dimension_semantics = [], scalar_prefetch = 0 : i64, scratch_operands = 1 : i64, tpu.core_type = #tpu.core_type<tc>} {
    %cst = arith.constant 0.000000e+00 : f32
    %0 = vector.broadcast %cst : f32 to vector<8x128xf32>
    %c0 = arith.constant 0 : index
    %c0_0 = arith.constant 0 : index
    %1 = vector.load %arg10[%c0, %c0_0] : memref<8x512xf32, #tpu.memory_space<vmem>>, vector<8x128xf32>
    tpu.vector_store %arg10[%c0, %c0_0], %0 {strides = array<i32>} : memref<8x512xf32, #tpu.memory_space<vmem>>, vector<8x128xf32>,
    %cst_1 = arith.constant 0.000000e+00 : f32
    %2 = vector.broadcast %cst_1 : f32 to vector<8x128xf32>
    %c0_2 = arith.constant 0 : index
    %c384 = arith.constant 384 : index
    %3 = vector.load %arg10[%c0_2, %c384] : memref<8x512xf32, #tpu.memory_space<vmem>>, vector<8x128xf32>
    tpu.vector_store %arg10[%c0_2, %c384], %2 {strides = array<i32>} : memref<8x512xf32, #tpu.memory_space<vmem>>, vector<8x128xf32>,
    %c0_3 = arith.constant 0 : index
    %c0_4 = arith.constant 0 : index
    %4 = vector.load %arg1[%c0_3, %c0_4] : memref<3x256xf32, #tpu.memory_space<vmem>>, vector<3x256xf32>
    %c0_5 = arith.constant 0 : index
    %c0_6 = arith.constant 0 : index
    %c0_7 = arith.constant 0 : index
    %c0_8 = arith.constant 0 : index
    %5 = vector.load %arg2[%c0_5, %c0_6, %c0_7, %c0_8] : memref<3x3x8x1xf32, #tpu.memory_space<vmem>>, vector<3x3x8x1xf32>
    %c0_9 = arith.constant 0 : index
    %c0_10 = arith.constant 0 : index
    %6 = vector.load %arg3[%c0_9, %c0_10] : memref<8x8xf32, #tpu.memory_space<vmem>>, vector<8x8xf32>
    %c0_11 = arith.constant 0 : index
    %c0_12 = arith.constant 0 : index
    %7 = vector.load %arg4[%c0_11, %c0_12] : memref<8x8xf32, #tpu.memory_space<vmem>>, vector<8x8xf32>
    %c0_13 = arith.constant 0 : index
    %c0_14 = arith.constant 0 : index
    %8 = vector.load %arg0[%c0_13, %c0_14] : memref<8x256xf32, #tpu.memory_space<vmem>>, vector<8x256xf32>
    %c0_15 = arith.constant 0 : index
    %c0_16 = arith.constant 0 : index
    %9 = vector.load %arg5[%c0_15, %c0_16] : memref<8x1xf32, #tpu.memory_space<vmem>>, vector<8x1xf32>
    %c0_17 = arith.constant 0 : index
    %c0_18 = arith.constant 0 : index
    %10 = vector.load %arg6[%c0_17, %c0_18] : memref<8x1xf32, #tpu.memory_space<vmem>>, vector<8x1xf32>
    %cst_19 = arith.constant 0.000000e+00 : f32
    %11 = vector.broadcast %cst_19 : f32 to vector<8x256xf32>
    %12 = arith.maximumf %8, %11 : vector<8x256xf32>
    %cst_20 = arith.constant dense<0.000000e+00> : vector<8x256xf32>
    %13 = tpu.matmul %7, %12, %cst_20 {dimension_numbers = #tpu.dot_dimension_numbers<[1], [0], [0], [1], [0, 0, 1, 1], [], []>} : vector<8x8xf32>, vector<8x256xf32>, vector<8x256xf32> -> vector<8x256xf32>
    %14 = arith.mulf %12, %12 : vector<8x256xf32>
    %cst_21 = arith.constant dense<0.000000e+00> : vector<8x256xf32>
    %15 = tpu.matmul %7, %14, %cst_21 {dimension_numbers = #tpu.dot_dimension_numbers<[1], [0], [0], [1], [0, 0, 1, 1], [], []>} : vector<8x8xf32>, vector<8x256xf32>, vector<8x256xf32> -> vector<8x256xf32>
    %cst_22 = arith.constant dense<0.000000e+00> : vector<8xf32>
    %16 = vector.multi_reduction <add>, %13, %cst_22 [1] : vector<8x256xf32> to vector<8xf32>
    %17 = vector.shape_cast %16 : vector<8xf32> to vector<8x1xf32>
    %cst_23 = arith.constant 0.001953125 : f32
    %18 = vector.broadcast %cst_23 : f32 to vector<8x1xf32>
    %19 = arith.mulf %17, %18 : vector<8x1xf32>
    %cst_24 = arith.constant dense<0.000000e+00> : vector<8xf32>
    %20 = vector.multi_reduction <add>, %15, %cst_24 [1] : vector<8x256xf32> to vector<8xf32>
    %21 = vector.shape_cast %20 : vector<8xf32> to vector<8x1xf32>
    %cst_25 = arith.constant 0.001953125 : f32
    %22 = vector.broadcast %cst_25 : f32 to vector<8x1xf32>
    %23 = arith.mulf %21, %22 : vector<8x1xf32>
    %24 = arith.mulf %19, %19 : vector<8x1xf32>
    %25 = arith.subf %23, %24 : vector<8x1xf32>
    %cst_26 = arith.constant 0.000000e+00 : f32
    %26 = vector.broadcast %cst_26 : f32 to vector<8x1xf32>
    %27 = arith.maximumf %25, %26 : vector<8x1xf32>
    %cst_27 = arith.constant 9.99999974E-6 : f32
    %28 = vector.broadcast %cst_27 : f32 to vector<8x1xf32>
    %29 = arith.addf %27, %28 : vector<8x1xf32>
    %30 = math.rsqrt %29 : vector<8x1xf32>
    %31 = arith.mulf %9, %30 : vector<8x1xf32>
    %32 = arith.mulf %19, %31 : vector<8x1xf32>
    %33 = arith.subf %10, %32 : vector<8x1xf32>
    %34 = vector.broadcast %31 : vector<8x1xf32> to vector<8x256xf32>
    %35 = arith.mulf %12, %34 : vector<8x256xf32>
    %36 = vector.broadcast %33 : vector<8x1xf32> to vector<8x256xf32>
    %37 = arith.addf %35, %36 : vector<8x256xf32>
    %c0_28 = arith.constant 0 : index
    %c128 = arith.constant 128 : index
    %38 = vector.load %arg10[%c0_28, %c128] : memref<8x512xf32, #tpu.memory_space<vmem>>, vector<8x256xf32>
    tpu.vector_store %arg10[%c0_28, %c128], %37 {strides = array<i32>} : memref<8x512xf32, #tpu.memory_space<vmem>>, vector<8x256xf32>,
    %c0_29 = arith.constant 0 : index
    %c111 = arith.constant 111 : index
    %39 = vector.load %arg10[%c0_29, %c111] : memref<8x512xf32, #tpu.memory_space<vmem>>, vector<8x256xf32>
    %40 = vector.extract_strided_slice %5 {offsets = [0, 0, 0, 0], sizes = [1, 1, 8, 1], strides = [1, 1, 1, 1]} : vector<3x3x8x1xf32> to vector<1x1x8x1xf32>
    %41 = vector.shape_cast %40 : vector<1x1x8x1xf32> to vector<8x1xf32>
    %42 = vector.broadcast %41 : vector<8x1xf32> to vector<8x256xf32>
    %43 = arith.mulf %39, %42 : vector<8x256xf32>
    %c0_30 = arith.constant 0 : index
    %c127 = arith.constant 127 : index
    %44 = vector.load %arg10[%c0_30, %c127] : memref<8x512xf32, #tpu.memory_space<vmem>>, vector<8x256xf32>
    %45 = vector.extract_strided_slice %5 {offsets = [1, 0, 0, 0], sizes = [1, 1, 8, 1], strides = [1, 1, 1, 1]} : vector<3x3x8x1xf32> to vector<1x1x8x1xf32>
    %46 = vector.shape_cast %45 : vector<1x1x8x1xf32> to vector<8x1xf32>
    %47 = vector.broadcast %46 : vector<8x1xf32> to vector<8x256xf32>
    %48 = arith.mulf %44, %47 : vector<8x256xf32>
    %49 = arith.addf %43, %48 : vector<8x256xf32>
    %c0_31 = arith.constant 0 : index
    %c143 = arith.constant 143 : index
    %50 = vector.load %arg10[%c0_31, %c143] : memref<8x512xf32, #tpu.memory_space<vmem>>, vector<8x256xf32>
    %51 = vector.extract_strided_slice %5 {offsets = [2, 0, 0, 0], sizes = [1, 1, 8, 1], strides = [1, 1, 1, 1]} : vector<3x3x8x1xf32> to vector<1x1x8x1xf32>
    %52 = vector.shape_cast %51 : vector<1x1x8x1xf32> to vector<8x1xf32>
    %53 = vector.broadcast %52 : vector<8x1xf32> to vector<8x256xf32>
    %54 = arith.mulf %50, %53 : vector<8x256xf32>
    %55 = arith.addf %49, %54 : vector<8x256xf32>
    %56 = vector.extract_strided_slice %4 {offsets = [0, 0], sizes = [1, 256], strides = [1, 1]} : vector<3x256xf32> to vector<1x256xf32>
    %57 = vector.broadcast %56 : vector<1x256xf32> to vector<8x256xf32>
    %58 = arith.mulf %55, %57 : vector<8x256xf32>
    %c0_32 = arith.constant 0 : index
    %c112 = arith.constant 112 : index
    %59 = vector.load %arg10[%c0_32, %c112] : memref<8x512xf32, #tpu.memory_space<vmem>>, vector<8x256xf32>
    %60 = vector.extract_strided_slice %5 {offsets = [0, 1, 0, 0], sizes = [1, 1, 8, 1], strides = [1, 1, 1, 1]} : vector<3x3x8x1xf32> to vector<1x1x8x1xf32>
    %61 = vector.shape_cast %60 : vector<1x1x8x1xf32> to vector<8x1xf32>
    %62 = vector.broadcast %61 : vector<8x1xf32> to vector<8x256xf32>
    %63 = arith.mulf %59, %62 : vector<8x256xf32>
    %c0_33 = arith.constant 0 : index
    %c128_34 = arith.constant 128 : index
    %64 = vector.load %arg10[%c0_33, %c128_34] : memref<8x512xf32, #tpu.memory_space<vmem>>, vector<8x256xf32>
    %65 = vector.extract_strided_slice %5 {offsets = [1, 1, 0, 0], sizes = [1, 1, 8, 1], strides = [1, 1, 1, 1]} : vector<3x3x8x1xf32> to vector<1x1x8x1xf32>
    %66 = vector.shape_cast %65 : vector<1x1x8x1xf32> to vector<8x1xf32>
    %67 = vector.broadcast %66 : vector<8x1xf32> to vector<8x256xf32>
    %68 = arith.mulf %64, %67 : vector<8x256xf32>
    %69 = arith.addf %63, %68 : vector<8x256xf32>
    %c0_35 = arith.constant 0 : index
    %c144 = arith.constant 144 : index
    %70 = vector.load %arg10[%c0_35, %c144] : memref<8x512xf32, #tpu.memory_space<vmem>>, vector<8x256xf32>
    %71 = vector.extract_strided_slice %5 {offsets = [2, 1, 0, 0], sizes = [1, 1, 8, 1], strides = [1, 1, 1, 1]} : vector<3x3x8x1xf32> to vector<1x1x8x1xf32>
    %72 = vector.shape_cast %71 : vector<1x1x8x1xf32> to vector<8x1xf32>
    %73 = vector.broadcast %72 : vector<8x1xf32> to vector<8x256xf32>
    %74 = arith.mulf %70, %73 : vector<8x256xf32>
    %75 = arith.addf %69, %74 : vector<8x256xf32>
    %76 = arith.addf %58, %75 : vector<8x256xf32>
    %c0_36 = arith.constant 0 : index
    %c113 = arith.constant 113 : index
    %77 = vector.load %arg10[%c0_36, %c113] : memref<8x512xf32, #tpu.memory_space<vmem>>, vector<8x256xf32>
    %78 = vector.extract_strided_slice %5 {offsets = [0, 2, 0, 0], sizes = [1, 1, 8, 1], strides = [1, 1, 1, 1]} : vector<3x3x8x1xf32> to vector<1x1x8x1xf32>
    %79 = vector.shape_cast %78 : vector<1x1x8x1xf32> to vector<8x1xf32>
    %80 = vector.broadcast %79 : vector<8x1xf32> to vector<8x256xf32>
    %81 = arith.mulf %77, %80 : vector<8x256xf32>
    %c0_37 = arith.constant 0 : index
    %c129 = arith.constant 129 : index
    %82 = vector.load %arg10[%c0_37, %c129] : memref<8x512xf32, #tpu.memory_space<vmem>>, vector<8x256xf32>
    %83 = vector.extract_strided_slice %5 {offsets = [1, 2, 0, 0], sizes = [1, 1, 8, 1], strides = [1, 1, 1, 1]} : vector<3x3x8x1xf32> to vector<1x1x8x1xf32>
    %84 = vector.shape_cast %83 : vector<1x1x8x1xf32> to vector<8x1xf32>
    %85 = vector.broadcast %84 : vector<8x1xf32> to vector<8x256xf32>
    %86 = arith.mulf %82, %85 : vector<8x256xf32>
    %87 = arith.addf %81, %86 : vector<8x256xf32>
    %c0_38 = arith.constant 0 : index
    %c145 = arith.constant 145 : index
    %88 = vector.load %arg10[%c0_38, %c145] : memref<8x512xf32, #tpu.memory_space<vmem>>, vector<8x256xf32>
    %89 = vector.extract_strided_slice %5 {offsets = [2, 2, 0, 0], sizes = [1, 1, 8, 1], strides = [1, 1, 1, 1]} : vector<3x3x8x1xf32> to vector<1x1x8x1xf32>
    %90 = vector.shape_cast %89 : vector<1x1x8x1xf32> to vector<8x1xf32>
    %91 = vector.broadcast %90 : vector<8x1xf32> to vector<8x256xf32>
    %92 = arith.mulf %88, %91 : vector<8x256xf32>
    %93 = arith.addf %87, %92 : vector<8x256xf32>
    %94 = vector.extract_strided_slice %4 {offsets = [2, 0], sizes = [1, 256], strides = [1, 1]} : vector<3x256xf32> to vector<1x256xf32>
    %95 = vector.broadcast %94 : vector<1x256xf32> to vector<8x256xf32>
    %96 = arith.mulf %93, %95 : vector<8x256xf32>
    %97 = arith.addf %76, %96 : vector<8x256xf32>
    %cst_39 = arith.constant dense<0.000000e+00> : vector<8x256xf32>
    %98 = tpu.matmul %6, %97, %cst_39 {dimension_numbers = #tpu.dot_dimension_numbers<[1], [0], [0], [1], [0, 0, 1, 1], [], []>} : vector<8x8xf32>, vector<8x256xf32>, vector<8x256xf32> -> vector<8x256xf32>
    %c0_40 = arith.constant 0 : index
    %c0_41 = arith.constant 0 : index
    %99 = vector.load %arg7[%c0_40, %c0_41] : memref<8x1xf32, #tpu.memory_space<vmem>>, vector<8x1xf32>
    %c0_42 = arith.constant 0 : index
    %c0_43 = arith.constant 0 : index
    %100 = vector.load %arg8[%c0_42, %c0_43] : memref<8x1xf32, #tpu.memory_space<vmem>>, vector<8x1xf32>
    %cst_44 = arith.constant 0.000000e+00 : f32
    %101 = vector.broadcast %cst_44 : f32 to vector<8x256xf32>
    %102 = arith.maximumf %98, %101 : vector<8x256xf32>
    %cst_45 = arith.constant dense<0.000000e+00> : vector<8x256xf32>
    %103 = tpu.matmul %7, %102, %cst_45 {dimension_numbers = #tpu.dot_dimension_numbers<[1], [0], [0], [1], [0, 0, 1, 1], [], []>} : vector<8x8xf32>, vector<8x256xf32>, vector<8x256xf32> -> vector<8x256xf32>
    %104 = arith.mulf %102, %102 : vector<8x256xf32>
    %cst_46 = arith.constant dense<0.000000e+00> : vector<8x256xf32>
    %105 = tpu.matmul %7, %104, %cst_46 {dimension_numbers = #tpu.dot_dimension_numbers<[1], [0], [0], [1], [0, 0, 1, 1], [], []>} : vector<8x8xf32>, vector<8x256xf32>, vector<8x256xf32> -> vector<8x256xf32>
    %cst_47 = arith.constant dense<0.000000e+00> : vector<8xf32>
    %106 = vector.multi_reduction <add>, %103, %cst_47 [1] : vector<8x256xf32> to vector<8xf32>
    %107 = vector.shape_cast %106 : vector<8xf32> to vector<8x1xf32>
    %cst_48 = arith.constant 0.001953125 : f32
    %108 = vector.broadcast %cst_48 : f32 to vector<8x1xf32>
    %109 = arith.mulf %107, %108 : vector<8x1xf32>
    %cst_49 = arith.constant dense<0.000000e+00> : vector<8xf32>
    %110 = vector.multi_reduction <add>, %105, %cst_49 [1] : vector<8x256xf32> to vector<8xf32>
    %111 = vector.shape_cast %110 : vector<8xf32> to vector<8x1xf32>
    %cst_50 = arith.constant 0.001953125 : f32
    %112 = vector.broadcast %cst_50 : f32 to vector<8x1xf32>
    %113 = arith.mulf %111, %112 : vector<8x1xf32>
    %114 = arith.mulf %109, %109 : vector<8x1xf32>
    %115 = arith.subf %113, %114 : vector<8x1xf32>
    %cst_51 = arith.constant 0.000000e+00 : f32
    %116 = vector.broadcast %cst_51 : f32 to vector<8x1xf32>
    %117 = arith.maximumf %115, %116 : vector<8x1xf32>
    %cst_52 = arith.constant 9.99999974E-6 : f32
    %118 = vector.broadcast %cst_52 : f32 to vector<8x1xf32>
    %119 = arith.addf %117, %118 : vector<8x1xf32>
    %120 = math.rsqrt %119 : vector<8x1xf32>
    %121 = arith.mulf %99, %120 : vector<8x1xf32>
    %122 = arith.mulf %109, %121 : vector<8x1xf32>
    %123 = arith.subf %100, %122 : vector<8x1xf32>
    %124 = vector.broadcast %121 : vector<8x1xf32> to vector<8x256xf32>
    %125 = arith.mulf %102, %124 : vector<8x256xf32>
    %126 = vector.broadcast %123 : vector<8x1xf32> to vector<8x256xf32>
    %127 = arith.addf %125, %126 : vector<8x256xf32>
    %c0_53 = arith.constant 0 : index
    %c128_54 = arith.constant 128 : index
    %128 = vector.load %arg10[%c0_53, %c128_54] : memref<8x512xf32, #tpu.memory_space<vmem>>, vector<8x256xf32>
    tpu.vector_store %arg10[%c0_53, %c128_54], %127 {strides = array<i32>} : memref<8x512xf32, #tpu.memory_space<vmem>>, vector<8x256xf32>,
    %c0_55 = arith.constant 0 : index
    %c111_56 = arith.constant 111 : index
    %129 = vector.load %arg10[%c0_55, %c111_56] : memref<8x512xf32, #tpu.memory_space<vmem>>, vector<8x256xf32>
    %130 = vector.extract_strided_slice %5 {offsets = [0, 0, 0, 0], sizes = [1, 1, 8, 1], strides = [1, 1, 1, 1]} : vector<3x3x8x1xf32> to vector<1x1x8x1xf32>
    %131 = vector.shape_cast %130 : vector<1x1x8x1xf32> to vector<8x1xf32>
    %132 = vector.broadcast %131 : vector<8x1xf32> to vector<8x256xf32>
    %133 = arith.mulf %129, %132 : vector<8x256xf32>
    %c0_57 = arith.constant 0 : index
    %c127_58 = arith.constant 127 : index
    %134 = vector.load %arg10[%c0_57, %c127_58] : memref<8x512xf32, #tpu.memory_space<vmem>>, vector<8x256xf32>
    %135 = vector.extract_strided_slice %5 {offsets = [1, 0, 0, 0], sizes = [1, 1, 8, 1], strides = [1, 1, 1, 1]} : vector<3x3x8x1xf32> to vector<1x1x8x1xf32>
    %136 = vector.shape_cast %135 : vector<1x1x8x1xf32> to vector<8x1xf32>
    %137 = vector.broadcast %136 : vector<8x1xf32> to vector<8x256xf32>
    %138 = arith.mulf %134, %137 : vector<8x256xf32>
    %139 = arith.addf %133, %138 : vector<8x256xf32>
    %c0_59 = arith.constant 0 : index
    %c143_60 = arith.constant 143 : index
    %140 = vector.load %arg10[%c0_59, %c143_60] : memref<8x512xf32, #tpu.memory_space<vmem>>, vector<8x256xf32>
    %141 = vector.extract_strided_slice %5 {offsets = [2, 0, 0, 0], sizes = [1, 1, 8, 1], strides = [1, 1, 1, 1]} : vector<3x3x8x1xf32> to vector<1x1x8x1xf32>
    %142 = vector.shape_cast %141 : vector<1x1x8x1xf32> to vector<8x1xf32>
    %143 = vector.broadcast %142 : vector<8x1xf32> to vector<8x256xf32>
    %144 = arith.mulf %140, %143 : vector<8x256xf32>
    %145 = arith.addf %139, %144 : vector<8x256xf32>
    %146 = vector.extract_strided_slice %4 {offsets = [0, 0], sizes = [1, 256], strides = [1, 1]} : vector<3x256xf32> to vector<1x256xf32>
    %147 = vector.broadcast %146 : vector<1x256xf32> to vector<8x256xf32>
    %148 = arith.mulf %145, %147 : vector<8x256xf32>
    %c0_61 = arith.constant 0 : index
    %c112_62 = arith.constant 112 : index
    %149 = vector.load %arg10[%c0_61, %c112_62] : memref<8x512xf32, #tpu.memory_space<vmem>>, vector<8x256xf32>
    %150 = vector.extract_strided_slice %5 {offsets = [0, 1, 0, 0], sizes = [1, 1, 8, 1], strides = [1, 1, 1, 1]} : vector<3x3x8x1xf32> to vector<1x1x8x1xf32>
    %151 = vector.shape_cast %150 : vector<1x1x8x1xf32> to vector<8x1xf32>
    %152 = vector.broadcast %151 : vector<8x1xf32> to vector<8x256xf32>
    %153 = arith.mulf %149, %152 : vector<8x256xf32>
    %c0_63 = arith.constant 0 : index
    %c128_64 = arith.constant 128 : index
    %154 = vector.load %arg10[%c0_63, %c128_64] : memref<8x512xf32, #tpu.memory_space<vmem>>, vector<8x256xf32>
    %155 = vector.extract_strided_slice %5 {offsets = [1, 1, 0, 0], sizes = [1, 1, 8, 1], strides = [1, 1, 1, 1]} : vector<3x3x8x1xf32> to vector<1x1x8x1xf32>
    %156 = vector.shape_cast %155 : vector<1x1x8x1xf32> to vector<8x1xf32>
    %157 = vector.broadcast %156 : vector<8x1xf32> to vector<8x256xf32>
    %158 = arith.mulf %154, %157 : vector<8x256xf32>
    %159 = arith.addf %153, %158 : vector<8x256xf32>
    %c0_65 = arith.constant 0 : index
    %c144_66 = arith.constant 144 : index
    %160 = vector.load %arg10[%c0_65, %c144_66] : memref<8x512xf32, #tpu.memory_space<vmem>>, vector<8x256xf32>
    %161 = vector.extract_strided_slice %5 {offsets = [2, 1, 0, 0], sizes = [1, 1, 8, 1], strides = [1, 1, 1, 1]} : vector<3x3x8x1xf32> to vector<1x1x8x1xf32>
    %162 = vector.shape_cast %161 : vector<1x1x8x1xf32> to vector<8x1xf32>
    %163 = vector.broadcast %162 : vector<8x1xf32> to vector<8x256xf32>
    %164 = arith.mulf %160, %163 : vector<8x256xf32>
    %165 = arith.addf %159, %164 : vector<8x256xf32>
    %166 = arith.addf %148, %165 : vector<8x256xf32>
    %c0_67 = arith.constant 0 : index
    %c113_68 = arith.constant 113 : index
    %167 = vector.load %arg10[%c0_67, %c113_68] : memref<8x512xf32, #tpu.memory_space<vmem>>, vector<8x256xf32>
    %168 = vector.extract_strided_slice %5 {offsets = [0, 2, 0, 0], sizes = [1, 1, 8, 1], strides = [1, 1, 1, 1]} : vector<3x3x8x1xf32> to vector<1x1x8x1xf32>
    %169 = vector.shape_cast %168 : vector<1x1x8x1xf32> to vector<8x1xf32>
    %170 = vector.broadcast %169 : vector<8x1xf32> to vector<8x256xf32>
    %171 = arith.mulf %167, %170 : vector<8x256xf32>
    %c0_69 = arith.constant 0 : index
    %c129_70 = arith.constant 129 : index
    %172 = vector.load %arg10[%c0_69, %c129_70] : memref<8x512xf32, #tpu.memory_space<vmem>>, vector<8x256xf32>
    %173 = vector.extract_strided_slice %5 {offsets = [1, 2, 0, 0], sizes = [1, 1, 8, 1], strides = [1, 1, 1, 1]} : vector<3x3x8x1xf32> to vector<1x1x8x1xf32>
    %174 = vector.shape_cast %173 : vector<1x1x8x1xf32> to vector<8x1xf32>
    %175 = vector.broadcast %174 : vector<8x1xf32> to vector<8x256xf32>
    %176 = arith.mulf %172, %175 : vector<8x256xf32>
    %177 = arith.addf %171, %176 : vector<8x256xf32>
    %c0_71 = arith.constant 0 : index
    %c145_72 = arith.constant 145 : index
    %178 = vector.load %arg10[%c0_71, %c145_72] : memref<8x512xf32, #tpu.memory_space<vmem>>, vector<8x256xf32>
    %179 = vector.extract_strided_slice %5 {offsets = [2, 2, 0, 0], sizes = [1, 1, 8, 1], strides = [1, 1, 1, 1]} : vector<3x3x8x1xf32> to vector<1x1x8x1xf32>
    %180 = vector.shape_cast %179 : vector<1x1x8x1xf32> to vector<8x1xf32>
    %181 = vector.broadcast %180 : vector<8x1xf32> to vector<8x256xf32>
    %182 = arith.mulf %178, %181 : vector<8x256xf32>
    %183 = arith.addf %177, %182 : vector<8x256xf32>
    %184 = vector.extract_strided_slice %4 {offsets = [2, 0], sizes = [1, 256], strides = [1, 1]} : vector<3x256xf32> to vector<1x256xf32>
    %185 = vector.broadcast %184 : vector<1x256xf32> to vector<8x256xf32>
    %186 = arith.mulf %183, %185 : vector<8x256xf32>
    %187 = arith.addf %166, %186 : vector<8x256xf32>
    %cst_73 = arith.constant dense<0.000000e+00> : vector<8x256xf32>
    %188 = tpu.matmul %6, %187, %cst_73 {dimension_numbers = #tpu.dot_dimension_numbers<[1], [0], [0], [1], [0, 0, 1, 1], [], []>} : vector<8x8xf32>, vector<8x256xf32>, vector<8x256xf32> -> vector<8x256xf32>
    %c0_74 = arith.constant 0 : index
    %c0_75 = arith.constant 0 : index
    %189 = vector.load %arg9[%c0_74, %c0_75] : memref<8x256xf32, #tpu.memory_space<vmem>>, vector<8x256xf32>
    tpu.vector_store %arg9[%c0_74, %c0_75], %188 {strides = array<i32>} : memref<8x256xf32, #tpu.memory_space<vmem>>, vector<8x256xf32>,
    return
  }
}

</mosaic_0001>

<bundles_post_ra>
// kernel: tile.33
= control target key start
LH: loop header
LB: loop body
LE: loop exit
PB: predicated region body
PF: predicated region fallthrough
CT: control target
= control target key end

     0   :  { %s22_s0 = inlined_call_operand.vmem [shape: f32[4], index: 0, kind: input, shape index: {}]   ;;  %s23_s1 = inlined_call_operand.vmem [shape: f32[2,4], index: 1, kind: output, shape index: {}]  }
   0x1   :  { %v4_v0 = vld [vmem:[%s22_s0] ss:$0 sm:$0xff] }
   0x2   :  { %5 = vst [vmem:[%s23_s1] sm:$0x3] %v4_v0 }

// kernel: tile.0
= control target key start
LH: loop header
LB: loop body
LE: loop exit
PB: predicated region body
PF: predicated region fallthrough
CT: control target
= control target key end

     0   :  { %s35_s8 = smov 125   ;;  %vm8_vm0 = vcmask 7168   ;;  %s36_s11 = smov 126   ;;  %s62_s0 = inlined_call_operand.vmem [shape: f32[2,4], index: 0, kind: input, shape index: {}]   ;;  %s63_s1 = inlined_call_operand.vmem [shape: f32[8,1], index: 1, kind: output, shape index: {}]  }
   0x1   :  { %v5_v0 = vld [vmem:[%s62_s0] sm:$0x3]  ;;  %s34_s0 = smov 127  }
   0x2   :  { %6 = vst [vmem:[#allocation0] sm:$0x3] %v5_v0 }
   0x9   :  { %v10_v1 = vld [vmem:[#allocation0] sm:$0x3]  }
   0xa   :  { %v22_v2 = vld [vmem:[#allocation0] sm:$0x3]   ;;  %11 = vrot.lane.b32.xlu0 %v10_v1, %s34_s0 }
   0xb   :  { %23 = vrot.lane.b32.xlu1 %v22_v2, %s35_s8  ;;  %v7_v3 = vld [vmem:[#allocation0] sm:$0x3]  }
   0xc   :  { %v16_v4 = vld [vmem:[#allocation0] sm:$0x3]   ;;  %9 = vst.msk [vmem:[%s63_s1] ss:$4 sm:$0x3] %vm8_vm0, %v7_v3  }
   0xe   :  { %17 = vrot.lane.b32.xlu0 %v16_v4, %s36_s11 }
  0x7c   :  { %v12_v5 = vpop.permute.xlu0 %11  }
  0x7d   :  { %v24_v6 = vpop.permute.xlu1 %23   ;;  %28 = vst.msk [vmem:[%s63_s1 + $0x1] ss:$4 sm:$0x3] %vm8_vm0, %v12_v5  }
  0x7e   :  { %30 = vst.msk [vmem:[%s63_s1 + $0x3] ss:$4 sm:$0x3] %vm8_vm0, %v24_v6  }
  0x80   :  { %v18_v7 = vpop.permute.xlu0 %17  }
  0x81   :  { %29 = vst.msk [vmem:[%s63_s1 + $0x2] ss:$4 sm:$0x3] %vm8_vm0, %v18_v7  }

// kernel: node_forward.1
= control target key start
LH: loop header
LB: loop body
LE: loop exit
PB: predicated region body
PF: predicated region fallthrough
CT: control target
= control target key end

     0   :  { %v1059_v2 = vmov 0.0   ;;  %vm52_vm0 = vcmask 64512   ;;  %v1060_v14 = vmov 0   ;;  %s1061_s19 = smov 112   ;;  %s1062_s11 = smov 96   ;;  %v299_v43 = vlaneseq  ;;  %s1464_s0 = inlined_call_operand.vmem [shape: f32[8,256], index: 0, kind: input, shape index: {}]   ;;  %s1465_s4 = inlined_call_operand.vmem [shape: f32[8,8], index: 4, kind: input, shape index: {}]   ;;  %s1466_s2 = inlined_call_operand.vmem [shape: f32[3,3,8,1], index: 2, kind: input, shape index: {}]   ;;  %s1467_s5 = inlined_call_operand.vmem [shape: f32[8,1], index: 5, kind: input, shape index: {}]   ;;  %s1468_s6 = inlined_call_operand.vmem [shape: f32[8,1], index: 6, kind: input, shape index: {}]   ;;  %s1469_s1 = inlined_call_operand.vmem [shape: f32[3,256], index: 1, kind: input, shape index: {}]   ;;  %s1470_s3 = inlined_call_operand.vmem [shape: f32[8,8], index: 3, kind: input, shape index: {}]   ;;  %s1471_s7 = inlined_call_operand.vmem [shape: f32[8,1], index: 7, kind: input, shape index: {}]   ;;  %s1472_s8 = inlined_call_operand.vmem [shape: f32[8,1], index: 8, kind: input, shape index: {}]   ;;  %s1473_s9 = inlined_call_operand.vmem [shape: f32[8,256], index: 9, kind: output, shape index: {}]  }
   0x1   :  { %v47_v0 = vld [vmem:[%s1464_s0 + $0x8] sm:$0xff]  ;;  %v46_v1 = vld [vmem:[%s1464_s0] sm:$0xff]  ;;  %120 = vmatprep.mubr.f32.mxu0 %v1059_v2  ;;  %193 = vmatprep.mubr.f32.mxu1 %v1059_v2  ;;  %v42_v16 = vld [vmem:[%s1466_s2 + $0x38] sm:$0xff]  ;;  %s1064_s14 = smov 111   ;;  %vm289_vm1 = vcmask 785408   ;;  %vm260_vm2 = vcmask 916480  }
   0x2   :  { %v1126_v3 = vmax.f32 %v47_v0, 0.0  ;;  %v1128_v4 = vmax.f32 %v46_v1, 0.0  ;;  %v1133_v5 = vld [vmem:[%s1465_s4] sm:$0xff]  ;;  %1054 = vset.pattern.permute.xlu1 %v1060_v14  ;;  %v40_v15 = vld [vmem:[%s1466_s2 + $0x28] sm:$0xff]  ;;  %1053 = vset.pattern.permute.xlu0 %v1060_v14  ;;  %v38_v35 = vld [vmem:[%s1466_s2 + $0x18] sm:$0xff]  ;;  %v300_v50 = vshrl.u32 %v299_v43, 7 }
   0x3   :  { %412 = vperm.xlu1 %1054, %v40_v15   ;;  %v39_v17 = vld [vmem:[%s1466_s2 + $0x20] sm:$0xff]  ;;  %v41_v36 = vld [vmem:[%s1466_s2 + $0x30] sm:$0xff]  ;;  %v36_v37 = vld [vmem:[%s1466_s2 + $0x8] sm:$0xff]  ;;  %vm484_vm3 = vcmask 924672   ;;  %s1066_s15 = smov 126   ;;  %vm323_vm4 = vcmask 908288  }
   0x4   :  { %86 = vmatprep.subr.mxu0 %v1126_v3  ;;  %v128_v6 = vmul.f32 %v1126_v3, %v1126_v3  ;;  %v127_v7 = vmul.f32 %v1128_v4, %v1128_v4  ;;  %v48_v28 = vld [vmem:[%s1467_s5] sm:$0xff]  ;;  %v37_v38 = vld [vmem:[%s1466_s2 + $0x10] sm:$0xff]  ;;  %v466_v54 = vsub.s32 6, %v300_v50  ;;  %v462_v58 = vsub.s32 2, %v300_v50  ;;  %s1067_s16 = smov 17  }
   0x5   :  { %87 = vmatpush1.msra.mxu0 %v1128_v4  ;;  %v49_v31 = vld [vmem:[%s1468_s6] sm:$0xff]  ;;  %v301_v63 = vsub.s32 0, %v300_v50  ;;  %vm393_vm5 = vcmask 1039360   ;;  %vm501_vm6 = vcmask 1031168   ;;  %vm519_vm7 = vcmask 138240  }
   0x6   :  { %1038 = vmatmul.mubr.msk.f32.vlgmr.msra.gmra.mxu0 %vm52_vm0, %v1133_v5  ;;  %159 = vmatprep.subr.mxu1 %v128_v6  ;;  %v43_v34 = vld [vmem:[%s1466_s2 + $0x40] sm:$0xff] }
   0x7   :  { %160 = vmatpush1.msra.mxu1 %v127_v7  ;;  %591 = vmatprep.mubr.f32.mxu0 %v1059_v2  ;;  %v34_v55 = vld [vmem:[%s1469_s1] sm:$0x77]  ;;  %s1063_s1 = smov 113  }
   0x8   :  { %1039 = vmatmul.mubr.msk.f32.vlgmr.msra.gmra.mxu1 %vm52_vm0, %v1133_v5  ;;  %361 = vperm.xlu1 %1054, %v42_v16   ;;  %v467_v59 = vrot.slane %v34_v55, %v466_v54  ;;  %v463_v6 = vrot.slane %v34_v55, %v462_v58 }
   0x9   :  { %666 = vmatprep.mubr.f32.mxu1 %v1059_v2 }
   0xa   :  { %v477_v62 = vrot.slane %v467_v59, %v462_v58 }
  0x7e   :  { %v1156_v25 = vpop.permute.xlu1 %412 }
  0x7f   :  { %v1159_v27 = vmul.f32 0.0, %v1156_v25 }
  0x83   :  { %v1184_v39 = vpop.permute.xlu1 %361 }
  0x84   :  { %v1187_v40 = vmul.f32 0.0, %v1184_v39 }
  0xc6   :  { %v122_v8 = vpop.f32.mrf.mxu0 }
  0xc8   :  { %v124_v9 = vpop.f32.mrf.mxu0  ;;  %v195_v10 = vpop.f32.mrf.mxu1 }
  0xc9   :  { %v200_v11 = vadd.f32 %v124_v9, %v122_v8  ;;  %v473_v9 = vrot.slane %v463_v6, %v462_v58 }
  0xca   :  { %v197_v12 = vpop.f32.mrf.mxu1 }
  0xcb   :  { %201 = vadd.xlane.f32.xlu0 %v200_v11  ;;  %v204_v13 = vadd.f32 %v197_v12, %v195_v10  ;;  %v305_v11 = vsub.s32 4, %v300_v50 }
  0xcd   :  { %v306_v15 = vrot.slane %v34_v55, %v305_v11 }
  0xcf   :  { %205 = vadd.xlane.f32.xlu0 %v204_v13  ;;  %v35_v13 = vld [vmem:[%s1466_s2] sm:$0xff]  ;;  %s1065_s2 = smov 127  }
  0xe5   :  { %341 = vperm.xlu0 %1053, %v39_v17   ;;  %v316_v17 = vrot.slane %v306_v15, %v301_v63 }
  0xe9   :  { %425 = vrot.lane.b32.xlu0 %v1159_v27, %s1061_s19 }
 0x154   :  { %v202_v18 = vpop.xlane.xlu0 %201 }
 0x155   :  { %v203_v19 = vmul.f32 0.001953125, %v202_v18 }
 0x157   :  { %v208_v21 = vmul.f32 %v203_v19, %v203_v19 }
 0x158   :  { %v206_v20 = vpop.xlane.xlu0 %205 }
 0x159   :  { %v207_v22 = vmul.f32 0.001953125, %v206_v20 }
 0x15b   :  { %v209_v23 = vsub.f32 %v207_v22, %v208_v21 }
 0x15d   :  { %v210_v24 = vmax.f32 %v209_v23, 0.0 }
 0x15f   :  { %v211_v26 = vadd.f32 1e-05, %v210_v24 }
 0x160   :  { %v1192_v45 = vpop.permute.xlu0 %341 }
 0x161   :  { %1055 = vrsqrt.f32 %v211_v26 }
 0x164   :  { %v426_v23 = vpop.permute.xlu0 %425 }
 0x16e   :  { %v1056_v29 = vpop.eup %1055 }
 0x16f   :  { %v213_v30 = vmul.f32 %v1056_v29, %v48_v28 }
 0x171   :  { %218 = vperm.xlu1 %1054, %v213_v30   ;;  %v214_v32 = vmul.f32 %v213_v30, %v203_v19 }
 0x173   :  { %v215_v33 = vsub.f32 %v49_v31, %v214_v32 }
 0x175   :  { %225 = vperm.xlu1 %1054, %v215_v33  }
 0x179   :  { %437 = vperm.xlu1 %1054, %v43_v34  }
 0x17d   :  { %245 = vperm.xlu1 %1054, %v38_v35  }
 0x181   :  { %274 = vperm.xlu1 %1054, %v41_v36  }
 0x185   :  { %333 = vperm.xlu1 %1054, %v36_v37  }
 0x189   :  { %404 = vperm.xlu1 %1054, %v37_v38  }
 0x18d   :  { %374 = vrot.lane.b32.xlu1 %v1187_v40, %s1062_s11 }
 0x1ec   :  { %v219_v41 = vpop.permute.xlu1 %218 }
 0x1ed   :  { %v221_v42 = vmul.f32 %v219_v41, %v1128_v4  ;;  %v222_v46 = vmul.f32 %v219_v41, %v1126_v3  ;;  %v302_v3 = vrot.slane %v34_v55, %v301_v63 }
 0x1ef   :  { %v312_v8 = vrot.slane %v302_v3, %v301_v63 }
 0x1f0   :  { %v226_v44 = vpop.permute.xlu1 %225 }
 0x1f1   :  { %v1195_v47 = vadd.f32 %v226_v44, %v221_v42  ;;  %v1197_v48 = vadd.f32 %v226_v44, %v222_v46 }
 0x1f3   :  { %v344_v49 = vmul.f32 %v1192_v45, %v1195_v47  ;;  %v345_v53 = vmul.f32 %v1192_v45, %v1197_v48  ;;  %v365_v56 = vmul.f32 %v1184_v39, %v1197_v48  ;;  %v415_v57 = vmul.f32 %v1156_v25, %v1195_v47 }
 0x1f4   :  { %v1201_v51 = vpop.permute.xlu1 %437  ;;  %v416_v61 = vmul.f32 %v1156_v25, %v1197_v48  ;;  %v364_v1 = vmul.f32 %v1184_v39, %v1195_v47 }
 0x1f5   :  { %348 = vrot.lane.b32.xlu1 %v344_v49, %s1061_s19  ;;  %v1205_v52 = vmul.f32 0.0, %v1201_v51  ;;  %v440_v60 = vmul.f32 %v1201_v51, %v1195_v47  ;;  %v441_v7 = vmul.f32 %v1201_v51, %v1197_v48 }
 0x1f7   :  { %450 = vrot.lane.b32.xlu0 %v1205_v52, %s1062_s11 }
 0x1f8   :  { %v1227_v0 = vpop.permute.xlu1 %245 }
 0x1f9   :  { %350 = vrot.lane.b32.xlu1 %v345_v53, %s1061_s19  ;;  %v1233_v4 = vmul.f32 0.0, %v1227_v0  ;;  %v249_v10 = vmul.f32 %v1227_v0, %v1195_v47  ;;  %v250_v18 = vmul.f32 %v1227_v0, %v1197_v48 }
 0x1fb   :  { %372 = vrot.lane.b32.xlu0 %v365_v56, %s1062_s11 }
 0x1fc   :  { %v1242_v12 = vpop.permute.xlu1 %274 }
 0x1fd   :  { %421 = vrot.lane.b32.xlu1 %v415_v57, %s1061_s19  ;;  %v278_v14 = vmul.f32 %v1242_v12, %v1197_v48  ;;  %v1252_v16 = vmul.f32 0.0, %v1242_v12  ;;  %v277_v19 = vmul.f32 %v1242_v12, %v1195_v47 }
 0x1ff   :  { %446 = vrot.lane.b32.xlu0 %v440_v60, %s1062_s11 }
 0x200   :  { %v1262_v20 = vpop.permute.xlu1 %333 }
 0x201   :  { %423 = vrot.lane.b32.xlu1 %v416_v61, %s1061_s19  ;;  %v338_v28 = vmul.f32 %v1262_v20, %v1197_v48  ;;  %v1271_v36 = vmul.f32 0.0, %v1262_v20  ;;  %v337_v42 = vmul.f32 %v1262_v20, %v1195_v47 }
 0x203   :  { %482 = vrot.lane.b32.xlu0 %v477_v62, %s1063_s1 }
 0x204   :  { %v1264_v21 = vpop.permute.xlu1 %404 }
 0x205   :  { %370 = vrot.lane.b32.xlu1 %v364_v1, %s1062_s11  ;;  %v409_v49 = vmul.f32 %v1264_v21, %v1197_v48  ;;  %v408_v55 = vmul.f32 %v1264_v21, %v1195_v47  ;;  %v1288_v61 = vmul.f32 0.0, %v1264_v21 }
 0x207   :  { %254 = vrot.lane.b32.xlu0 %v1233_v4, %s1061_s19 }
 0x208   :  { %v375_v22 = vpop.permute.xlu1 %374 }
 0x209   :  { %448 = vrot.lane.b32.xlu1 %v441_v7, %s1062_s11 }
 0x20b   :  { %319 = vrot.lane.b32.xlu0 %v312_v8, %s1064_s14 }
 0x20d   :  { %480 = vrot.lane.b32.xlu1 %v473_v9, %s1063_s1 }
 0x20f   :  { %256 = vrot.lane.b32.xlu0 %v249_v10, %s1061_s19 }
 0x211   :  { %237 = vperm.xlu1 %1054, %v35_v13  }
 0x213   :  { %285 = vrot.lane.b32.xlu0 %v278_v14, %s1062_s11 }
 0x215   :  { %287 = vrot.lane.b32.xlu1 %v1252_v16, %s1062_s11 }
 0x219   :  { %321 = vrot.lane.b32.xlu1 %v316_v17, %s1064_s14 }
 0x21d   :  { %258 = vrot.lane.b32.xlu1 %v250_v18, %s1061_s19 }
 0x221   :  { %283 = vrot.lane.b32.xlu1 %v277_v19, %s1062_s11 }
 0x267   :  { %v349_v24 = vpop.permute.xlu1 %348 }
 0x268   :  { %v356_v37 = vadd.f32 %v349_v24, %v1271_v36 }
 0x269   :  { %v451_v26 = vpop.permute.xlu0 %450 }
 0x26b   :  { %v351_v29 = vpop.permute.xlu1 %350 }
 0x26c   :  { %v358_v30 = vadd.f32 %v351_v29, %v338_v28  ;;  %v352_v38 = vsel %vm260_vm2, %v349_v24, %v351_v29 }
 0x26d   :  { %v373_v31 = vpop.permute.xlu0 %372  ;;  %v357_v53 = vadd.f32 %v352_v38, %v337_v42 }
 0x26e   :  { %v377_v32 = vsel %vm289_vm1, %v373_v31, %v375_v22 }
 0x26f   :  { %v383_v33 = vadd.f32 %v377_v32, %v358_v30  ;;  %v422_v34 = vpop.permute.xlu1 %421 }
 0x270   :  { %v432_v3 = vadd.f32 %v422_v34, %v1288_v61 }
 0x271   :  { %391 = vrot.lane.b32.xlu1 %v383_v33, %s1065_s2  ;;  %v447_v43 = vpop.permute.xlu0 %446 }
 0x272   :  { %v457_v11 = vadd.f32 %v447_v43, %v432_v3 }
 0x273   :  { %v424_v35 = vpop.permute.xlu1 %423 }
 0x274   :  { %v428_v44 = vsel %vm260_vm2, %v424_v35, %v426_v23  ;;  %v427_v54 = vsel %vm260_vm2, %v422_v34, %v424_v35 }
 0x275   :  { %v434_v56 = vadd.f32 %v428_v44, %v409_v49  ;;  %v433_v62 = vadd.f32 %v427_v54, %v408_v55  ;;  %v1290_v1 = vpop.permute.xlu0 %482 }
 0x277   :  { %v371_v41 = vpop.permute.xlu1 %370 }
 0x278   :  { %v381_v46 = vadd.f32 %v371_v41, %v356_v37  ;;  %v376_v50 = vsel %vm289_vm1, %v371_v41, %v373_v31 }
 0x279   :  { %v382_v58 = vadd.f32 %v376_v50, %v357_v53  ;;  %v255_v15 = vpop.permute.xlu0 %254 }
 0x27a   :  { %387 = vrot.lane.b32.xlu0 %v381_v46, %s1065_s2 }
 0x27b   :  { %v449_v57 = vpop.permute.xlu1 %448 }
 0x27c   :  { %v452_v59 = vsel %vm289_vm1, %v447_v43, %v449_v57  ;;  %v453_v60 = vsel %vm289_vm1, %v449_v57, %v451_v26 }
 0x27d   :  { %v459_v63 = vadd.f32 %v453_v60, %v434_v56  ;;  %v458_v6 = vadd.f32 %v452_v59, %v433_v62  ;;  %v1308_v18 = vpop.permute.xlu0 %319 }
 0x27e   :  { %389 = vrot.lane.b32.xlu0 %v382_v58, %s1065_s2 }
 0x27f   :  { %v1294_v7 = vpop.permute.xlu1 %480  ;;  %v491_v8 = vmul.f32 %v1290_v1, %v459_v63 }
 0x280   :  { %v1299_v9 = vsel %vm484_vm3, %v1294_v7, %v1290_v1  ;;  %v489_v13 = vmul.f32 %v1294_v7, %v457_v11 }
 0x281   :  { %v490_v10 = vmul.f32 %v1299_v9, %v458_v6  ;;  %v257_v22 = vpop.permute.xlu0 %256 }
 0x282   :  { %499 = vrot.lane.b32.xlu0 %v491_v8, %s1066_s15  ;;  %v261_v41 = vsel %vm260_vm2, %v255_v15, %v257_v22 }
 0x283   :  { %497 = vrot.lane.b32.xlu1 %v490_v10, %s1066_s15 }
 0x285   :  { %v286_v26 = vpop.permute.xlu0 %285 }
 0x287   :  { %495 = vrot.lane.b32.xlu1 %v489_v13, %s1066_s15 }
 0x28c   :  { %v1306_v14 = vpop.permute.xlu1 %237 }
 0x28d   :  { %v242_v24 = vmul.f32 %v1306_v14, %v1197_v48  ;;  %v241_v31 = vmul.f32 %v1306_v14, %v1195_v47  ;;  %v1320_v38 = vmul.f32 0.0, %v1306_v14 }
 0x28f   :  { %v266_v44 = vadd.f32 %v261_v41, %v1320_v38 }
 0x290   :  { %v288_v17 = vpop.permute.xlu1 %287 }
 0x291   :  { %v291_v32 = vsel %vm289_vm1, %v286_v26, %v288_v17 }
 0x294   :  { %v1310_v19 = vpop.permute.xlu1 %321 }
 0x295   :  { %v1325_v42 = vsel %vm323_vm4, %v1308_v18, %v1310_v19 }
 0x298   :  { %v259_v23 = vpop.permute.xlu1 %258 }
 0x299   :  { %v268_v28 = vadd.f32 %v259_v23, %v242_v24  ;;  %v262_v30 = vsel %vm260_vm2, %v257_v22, %v259_v23  ;;  %v1342_v22 = vld [vmem:[%s1470_s3] sm:$0xff] }
 0x29a   :  { %v267_v35 = vadd.f32 %v262_v30, %v241_v31 }
 0x29b   :  { %v297_v37 = vadd.f32 %v291_v32, %v268_v28 }
 0x29c   :  { %v284_v29 = vpop.permute.xlu1 %283 }
 0x29d   :  { %v290_v33 = vsel %vm289_vm1, %v284_v29, %v286_v26  ;;  %v330_v46 = vmul.f32 %v1310_v19, %v297_v37  ;;  %v295_v50 = vadd.f32 %v284_v29, %v266_v44 }
 0x29e   :  { %v296_v48 = vadd.f32 %v290_v33, %v267_v35 }
 0x29f   :  { %v328_v62 = vmul.f32 %v1308_v18, %v295_v50 }
 0x2a0   :  { %v329_v54 = vmul.f32 %v1325_v42, %v296_v48 }
 0x2e3   :  { %v392_v47 = vpop.permute.xlu1 %391 }
 0x2e4   :  { %v401_v53 = vadd.f32 %v392_v47, %v330_v46 }
 0x2ec   :  { %v388_v34 = vpop.permute.xlu0 %387 }
 0x2f0   :  { %v390_v43 = vpop.permute.xlu0 %389 }
 0x2f1   :  { %v395_v49 = vsel %vm393_vm5, %v390_v43, %v392_v47  ;;  %v394_v59 = vsel %vm393_vm5, %v388_v34, %v390_v43 }
 0x2f2   :  { %v400_v56 = vadd.f32 %v395_v49, %v329_v54  ;;  %v399_v3 = vadd.f32 %v394_v59, %v328_v62 }
 0x2f4   :  { %v500_v55 = vpop.permute.xlu0 %499 }
 0x2f5   :  { %v509_v57 = vadd.f32 %v500_v55, %v401_v53  ;;  %v498_v58 = vpop.permute.xlu1 %497 }
 0x2f6   :  { %v503_v60 = vsel %vm501_vm6, %v498_v58, %v500_v55  ;;  %v599_v55 = vld [vmem:[%s1472_s8] sm:$0xff] }
 0x2f7   :  { %v508_v63 = vadd.f32 %v503_v60, %v400_v56  ;;  %517 = vrot.lane.b32.xlu1 %v509_v57, %s1067_s16 }
 0x2f9   :  { %v496_v6 = vpop.permute.xlu1 %495  ;;  %515 = vrot.lane.b32.xlu0 %v508_v63, %s1067_s16 }
 0x2fa   :  { %v502_v8 = vsel %vm501_vm6, %v496_v6, %v498_v58 }
 0x2fb   :  { %v507_v10 = vadd.f32 %v502_v8, %v399_v3 }
 0x2fd   :  { %513 = vrot.lane.b32.xlu0 %v507_v10, %s1067_s16 }
 0x369   :  { %v518_v11 = vpop.permute.xlu1 %517 }
 0x36b   :  { %v516_v13 = vpop.permute.xlu0 %515 }
 0x36c   :  { %v521_v15 = vsel %vm519_vm7, %v516_v13, %v518_v11 }
 0x36d   :  { %557 = vmatprep.subr.mxu0 %v521_v15 }
 0x36f   :  { %v514_v17 = vpop.permute.xlu0 %513 }
 0x370   :  { %v520_v23 = vsel %vm519_vm7, %v514_v17, %v516_v13 }
 0x371   :  { %558 = vmatpush1.msra.mxu0 %v520_v23 }
 0x372   :  { %1040 = vmatmul.mubr.msk.f32.vlgmr.msra.gmra.mxu0 %vm52_vm0, %v1342_v22 }
 0x373   :  { %739 = vmatprep.mubr.f32.mxu0 %v1059_v2 }
 0x432   :  { %v593_v24 = vpop.f32.mrf.mxu0 }
 0x433   :  { %v600_v26 = vmax.f32 %v593_v24, 0.0 }
 0x434   :  { %v595_v28 = vpop.f32.mrf.mxu0 }
 0x435   :  { %v601_v29 = vmax.f32 %v595_v28, 0.0  ;;  %v673_v31 = vmul.f32 %v600_v26, %v600_v26 }
 0x437   :  { %632 = vmatprep.subr.mxu1 %v601_v29  ;;  %v674_v30 = vmul.f32 %v601_v29, %v601_v29 }
 0x438   :  { %633 = vmatpush1.msra.mxu1 %v600_v26 }
 0x439   :  { %1041 = vmatmul.mubr.msk.f32.vlgmr.msra.gmra.mxu1 %vm52_vm0, %v1133_v5  ;;  %705 = vmatprep.subr.mxu0 %v674_v30 }
 0x43a   :  { %706 = vmatpush1.msra.mxu0 %v673_v31  ;;  %1025 = vmatprep.mubr.f32.mxu1 %v1059_v2  ;;  %v598_v2 = vld [vmem:[%s1471_s7] sm:$0xff] }
 0x43b   :  { %1042 = vmatmul.mubr.msk.f32.vlgmr.msra.gmra.mxu0 %vm52_vm0, %v1133_v5 }
 0x4f9   :  { %v668_v32 = vpop.f32.mrf.mxu1 }
 0x4fb   :  { %v670_v33 = vpop.f32.mrf.mxu1  ;;  %v741_v34 = vpop.f32.mrf.mxu0 }
 0x4fc   :  { %v746_v35 = vadd.f32 %v670_v33, %v668_v32 }
 0x4fd   :  { %v743_v37 = vpop.f32.mrf.mxu0 }
 0x4fe   :  { %v750_v48 = vadd.f32 %v743_v37, %v741_v34  ;;  %747 = vadd.xlane.f32.xlu1 %v746_v35 }
 0x500   :  { %751 = vadd.xlane.f32.xlu0 %v750_v48 }
 0x587   :  { %v748_v41 = vpop.xlane.xlu1 %747 }
 0x588   :  { %v749_v47 = vmul.f32 0.001953125, %v748_v41 }
 0x589   :  { %v752_v43 = vpop.xlane.xlu0 %751 }
 0x58a   :  { %v754_v44 = vmul.f32 %v749_v47, %v749_v47  ;;  %v753_v46 = vmul.f32 0.001953125, %v752_v43 }
 0x58c   :  { %v755_v49 = vsub.f32 %v753_v46, %v754_v44 }
 0x58e   :  { %v756_v50 = vmax.f32 %v755_v49, 0.0 }
 0x590   :  { %v757_v53 = vadd.f32 1e-05, %v756_v50 }
 0x592   :  { %1057 = vrsqrt.f32 %v757_v53 }
 0x59f   :  { %v1058_v5 = vpop.eup %1057 }
 0x5a0   :  { %v759_v54 = vmul.f32 %v1058_v5, %v598_v2 }
 0x5a2   :  { %764 = vperm.xlu0 %1053, %v759_v54   ;;  %v760_v56 = vmul.f32 %v759_v54, %v749_v47 }
 0x5a4   :  { %v761_v57 = vsub.f32 %v599_v55, %v760_v56 }
 0x5a6   :  { %858 = vrot.lane.b32.xlu0 %v1187_v40, %s1062_s11  ;;  %771 = vperm.xlu1 %1054, %v761_v57  }
 0x5aa   :  { %898 = vrot.lane.b32.xlu1 %v1159_v27, %s1061_s19 }
 0x61d   :  { %v765_v58 = vpop.permute.xlu0 %764 }
 0x61e   :  { %v767_v59 = vmul.f32 %v765_v58, %v600_v26  ;;  %v768_v60 = vmul.f32 %v765_v58, %v601_v29 }
 0x621   :  { %v772_v62 = vpop.permute.xlu1 %771 }
 0x622   :  { %v1363_v63 = vadd.f32 %v772_v62, %v767_v59  ;;  %v1365_v3 = vadd.f32 %v772_v62, %v768_v60 }
 0x624   :  { %v834_v6 = vmul.f32 %v1365_v3, %v1192_v45  ;;  %v833_v8 = vmul.f32 %v1363_v63, %v1192_v45  ;;  %v889_v27 = vmul.f32 %v1365_v3, %v1156_v25  ;;  %v888_v40 = vmul.f32 %v1363_v63, %v1156_v25 }
 0x625   :  { %v848_v10 = vmul.f32 %v1363_v63, %v1184_v39  ;;  %v849_v45 = vmul.f32 %v1365_v3, %v1184_v39  ;;  %v909_v11 = vmul.f32 %v1365_v3, %v1201_v51  ;;  %v908_v25 = vmul.f32 %v1363_v63, %v1201_v51  ;;  %v899_v15 = vpop.permute.xlu1 %898 }
 0x626   :  { %839 = vrot.lane.b32.xlu0 %v834_v6, %s1061_s19  ;;  %837 = vrot.lane.b32.xlu1 %v833_v8, %s1061_s19  ;;  %v785_v39 = vmul.f32 %v1363_v63, %v1227_v0  ;;  %v786_v51 = vmul.f32 %v1365_v3, %v1227_v0  ;;  %v808_v13 = vmul.f32 %v1365_v3, %v1242_v12 }
 0x627   :  { %v832_v0 = vmul.f32 %v1365_v3, %v1262_v20  ;;  %v886_v35 = vmul.f32 %v1363_v63, %v1264_v21  ;;  %v887_v49 = vmul.f32 %v1365_v3, %v1264_v21 }
 0x62a   :  { %896 = vrot.lane.b32.xlu0 %v889_v27, %s1061_s19  ;;  %894 = vrot.lane.b32.xlu1 %v888_v40, %s1061_s19 }
 0x62e   :  { %854 = vrot.lane.b32.xlu0 %v848_v10, %s1062_s11  ;;  %856 = vrot.lane.b32.xlu1 %v849_v45, %s1062_s11 }
 0x632   :  { %916 = vrot.lane.b32.xlu0 %v909_v11, %s1062_s11  ;;  %914 = vrot.lane.b32.xlu1 %v908_v25, %s1062_s11 }
 0x636   :  { %790 = vrot.lane.b32.xlu0 %v1233_v4, %s1061_s19  ;;  %918 = vrot.lane.b32.xlu1 %v1205_v52, %s1062_s11  ;;  %v807_v52 = vmul.f32 %v1363_v63, %v1242_v12  ;;  %v859_v4 = vpop.permute.xlu0 %858  ;;  %v831_v12 = vmul.f32 %v1363_v63, %v1262_v20 }
 0x63a   :  { %817 = vrot.lane.b32.xlu1 %v1252_v16, %s1062_s11  ;;  %792 = vrot.lane.b32.xlu0 %v785_v39, %s1061_s19 }
 0x63e   :  { %794 = vrot.lane.b32.xlu1 %v786_v51, %s1061_s19  ;;  %815 = vrot.lane.b32.xlu0 %v808_v13, %s1062_s11 }
 0x642   :  { %813 = vrot.lane.b32.xlu1 %v807_v52, %s1062_s11 }
 0x698   :  { %v840_v16 = vpop.permute.xlu0 %839  ;;  %v838_v17 = vpop.permute.xlu1 %837 }
 0x699   :  { %v845_v26 = vadd.f32 %v838_v17, %v1271_v36  ;;  %v847_v28 = vadd.f32 %v840_v16, %v832_v0  ;;  %v841_v29 = vsel %vm260_vm2, %v838_v17, %v840_v16 }
 0x69a   :  { %v846_v36 = vadd.f32 %v841_v29, %v831_v12 }
 0x69c   :  { %v897_v23 = vpop.permute.xlu0 %896  ;;  %v895_v24 = vpop.permute.xlu1 %894 }
 0x69d   :  { %v900_v32 = vsel %vm260_vm2, %v895_v24, %v897_v23  ;;  %v901_v20 = vsel %vm260_vm2, %v897_v23, %v899_v15  ;;  %v905_v50 = vadd.f32 %v895_v24, %v1288_v61 }
 0x69e   :  { %v906_v41 = vadd.f32 %v900_v32, %v886_v35  ;;  %v907_v2 = vadd.f32 %v901_v20, %v887_v49 }
 0x6a0   :  { %v855_v30 = vpop.permute.xlu0 %854  ;;  %v857_v31 = vpop.permute.xlu1 %856 }
 0x6a1   :  { %v865_v33 = vadd.f32 %v855_v30, %v845_v26  ;;  %v861_v34 = vsel %vm289_vm1, %v857_v31, %v859_v4  ;;  %v860_v37 = vsel %vm289_vm1, %v855_v30, %v857_v31 }
 0x6a2   :  { %v867_v48 = vadd.f32 %v861_v34, %v847_v28  ;;  %v866_v44 = vadd.f32 %v860_v37, %v846_v36 }
 0x6a3   :  { %871 = vrot.lane.b32.xlu0 %v865_v33, %s1065_s2 }
 0x6a4   :  { %v917_v47 = vpop.permute.xlu0 %916  ;;  %875 = vrot.lane.b32.xlu1 %v867_v48, %s1065_s2  ;;  %v915_v43 = vpop.permute.xlu1 %914 }
 0x6a5   :  { %v920_v46 = vsel %vm289_vm1, %v915_v43, %v917_v47  ;;  %v925_v5 = vadd.f32 %v915_v43, %v905_v50 }
 0x6a6   :  { %v926_v53 = vadd.f32 %v920_v46, %v906_v41 }
 0x6a7   :  { %873 = vrot.lane.b32.xlu0 %v866_v44, %s1065_s2  ;;  %v928_v58 = vmul.f32 %v925_v5, %v1294_v7 }
 0x6a8   :  { %v919_v54 = vpop.permute.xlu1 %918  ;;  %v929_v55 = vmul.f32 %v926_v53, %v1299_v9  ;;  %v791_v21 = vpop.permute.xlu0 %790  ;;  %v783_v9 = vmul.f32 %v1365_v3, %v1306_v14 }
 0x6a9   :  { %v921_v56 = vsel %vm289_vm1, %v917_v47, %v919_v54 }
 0x6aa   :  { %v927_v57 = vadd.f32 %v921_v56, %v907_v2  ;;  %936 = vrot.lane.b32.xlu1 %v929_v55, %s1066_s15 }
 0x6ac   :  { %v930_v59 = vmul.f32 %v927_v57, %v1290_v1  ;;  %v818_v61 = vpop.permute.xlu1 %817  ;;  %v793_v60 = vpop.permute.xlu0 %792  ;;  %v782_v1 = vmul.f32 %v1363_v63, %v1306_v14 }
 0x6ad   :  { %v796_v39 = vsel %vm260_vm2, %v791_v21, %v793_v60 }
 0x6ae   :  { %934 = vrot.lane.b32.xlu1 %v928_v58, %s1066_s15  ;;  %938 = vrot.lane.b32.xlu0 %v930_v59, %s1066_s15  ;;  %v801_v3 = vadd.f32 %v796_v39, %v1320_v38 }
 0x6b0   :  { %v795_v62 = vpop.permute.xlu1 %794  ;;  %v816_v6 = vpop.permute.xlu0 %815 }
 0x6b1   :  { %v797_v27 = vsel %vm260_vm2, %v793_v60, %v795_v62  ;;  %v803_v40 = vadd.f32 %v795_v62, %v783_v9  ;;  %v820_v7 = vsel %vm289_vm1, %v816_v6, %v818_v61 }
 0x6b2   :  { %v802_v11 = vadd.f32 %v797_v27, %v782_v1 }
 0x6b3   :  { %v826_v51 = vadd.f32 %v820_v7, %v803_v40 }
 0x6b4   :  { %v814_v8 = vpop.permute.xlu1 %813 }
 0x6b5   :  { %v819_v45 = vsel %vm289_vm1, %v814_v8, %v816_v6  ;;  %v829_v15 = vmul.f32 %v826_v51, %v1310_v19  ;;  %v824_v17 = vadd.f32 %v814_v8, %v801_v3 }
 0x6b6   :  { %v825_v13 = vadd.f32 %v819_v45, %v802_v11 }
 0x6b7   :  { %v827_v30 = vmul.f32 %v824_v17, %v1308_v18 }
 0x6b8   :  { %v828_v23 = vmul.f32 %v825_v13, %v1325_v42 }
 0x715   :  { %v872_v10 = vpop.permute.xlu0 %871 }
 0x716   :  { %v876_v25 = vpop.permute.xlu1 %875 }
 0x717   :  { %v884_v14 = vadd.f32 %v876_v25, %v829_v15 }
 0x719   :  { %v874_v52 = vpop.permute.xlu0 %873 }
 0x71a   :  { %v878_v16 = vsel %vm393_vm5, %v874_v52, %v876_v25  ;;  %v877_v26 = vsel %vm393_vm5, %v872_v10, %v874_v52 }
 0x71b   :  { %v883_v63 = vadd.f32 %v878_v16, %v828_v23  ;;  %v882_v19 = vadd.f32 %v877_v26, %v827_v30 }
 0x71c   :  { %v937_v4 = vpop.permute.xlu1 %936 }
 0x720   :  { %v939_v24 = vpop.permute.xlu0 %938  ;;  %v935_v0 = vpop.permute.xlu1 %934 }
 0x721   :  { %v941_v28 = vsel %vm501_vm6, %v937_v4, %v939_v24  ;;  %v947_v29 = vadd.f32 %v939_v24, %v884_v14  ;;  %v940_v31 = vsel %vm501_vm6, %v935_v0, %v937_v4 }
 0x722   :  { %v946_v38 = vadd.f32 %v941_v28, %v883_v63  ;;  %v945_v42 = vadd.f32 %v940_v31, %v882_v19 }
 0x723   :  { %955 = vrot.lane.b32.xlu1 %v947_v29, %s1067_s16 }
 0x724   :  { %953 = vrot.lane.b32.xlu0 %v946_v38, %s1067_s16 }
 0x728   :  { %951 = vrot.lane.b32.xlu0 %v945_v42, %s1067_s16 }
 0x795   :  { %v956_v12 = vpop.permute.xlu1 %955 }
 0x796   :  { %v954_v32 = vpop.permute.xlu0 %953 }
 0x797   :  { %v958_v33 = vsel %vm519_vm7, %v954_v32, %v956_v12 }
 0x798   :  { %991 = vmatprep.subr.mxu1 %v958_v33 }
 0x79a   :  { %v952_v34 = vpop.permute.xlu0 %951 }
 0x79b   :  { %v957_v35 = vsel %vm519_vm7, %v952_v34, %v954_v32 }
 0x79c   :  { %992 = vmatpush1.msra.mxu1 %v957_v35 }
 0x79d   :  { %1043 = vmatmul.mubr.msk.f32.vlgmr.msra.gmra.mxu1 %vm52_vm0, %v1342_v22 }
 0x85d   :  { %v1027_v18 = vpop.f32.mrf.mxu1 }
 0x85e   :  { %1032 = vst [vmem:[%s1473_s9] sm:$0xff] %v1027_v18 }
 0x85f   :  { %v1029_v37 = vpop.f32.mrf.mxu1 }
 0x860   :  { %1033 = vst [vmem:[%s1473_s9 + $0x8] sm:$0xff] %v1029_v37 }

</bundles_post_ra>
